<compile_context>
chip_gen: v7x
topology: tpu7x:2x2x1
jax: 0.10.0
libtpu: 0.0.40
codegen_flags: <defaults>
</compile_context>

<pallas_src>
import functools

import jax
import jax.numpy as jnp
from jax.experimental import pallas as pl
from jax.experimental.pallas import tpu as pltpu

_LANES = 128
_MAX_BLOCK_ROWS = 2048   # (2048, 128) f32 = 1 MiB per input pipeline buffer.


def _tversky_sums_kernel(x_ref, t_ref, out_ref, acc_pt, acc_p, acc_t,
                         *, total_n, block_rows, need_mask):
    """One grid step: per-lane partial sums for a (block_rows, 128) tile.

    x_ref, t_ref : (block_rows, 128) logits / targets tiles (native dtype, VMEM)
    out_ref      : (3,) f32 SMEM output, written once in the last-step epilogue:
                   out_ref[0] = sum(p*t), out_ref[1] = sum(p), out_ref[2] = sum(t)
    acc_*        : (block_rows, 128) f32 VMEM accumulators, resident across grid.
    """
    i = pl.program_id(0)

    @pl.when(i == 0)
    def _():
        acc_pt[...] = jnp.zeros_like(acc_pt)
        acc_p[...] = jnp.zeros_like(acc_p)
        acc_t[...] = jnp.zeros_like(acc_t)

    # Cast in-kernel so inputs stream from HBM at native width.
    p = jax.nn.sigmoid(x_ref[...].astype(jnp.float32))
    t = t_ref[...].astype(jnp.float32)

    if need_mask:
        # Mask the ragged tail (lane padding and/or last-block row overrun).
        # For interior blocks the predicate is all-true; the selects are cheap
        # VPU work hidden under the HBM-streaming roofline.
        row = jax.lax.broadcasted_iota(jnp.int32, (block_rows, _LANES), 0)
        lane = jax.lax.broadcasted_iota(jnp.int32, (block_rows, _LANES), 1)
        flat = (i * block_rows + row) * _LANES + lane
        valid = flat < total_n
        p = jnp.where(valid, p, 0.0)
        t = jnp.where(valid, t, 0.0)

    # Hot loop: VPU-only per-lane accumulation (no cross-lane XLU work).
    acc_pt[...] += p * t
    acc_p[...] += p
    acc_t[...] += t

    @pl.when(i == pl.num_programs(0) - 1)
    def _():
        out_ref[0] = jnp.sum(acc_pt[...])
        out_ref[1] = jnp.sum(acc_p[...])
        out_ref[2] = jnp.sum(acc_t[...])


def _tversky_sums(inputs, targets):
    """Pallas reduction: returns (sum(p*t), sum(p), sum(t)) as f32 scalars."""
    x = inputs.reshape(-1)     # free row-major flatten (matches torch .view(-1))
    t = targets.reshape(-1)
    n = x.shape[0]

    # Only pad (with zeros) when the flat length is not lane-aligned; the pad
    # region is masked out in-kernel, so the pad value is irrelevant.
    lane_pad = (-n) % _LANES
    if lane_pad:
        x = jnp.pad(x, (0, lane_pad))
        t = jnp.pad(t, (0, lane_pad))
    rows = (n + lane_pad) // _LANES

    x2 = x.reshape(rows, _LANES)
    t2 = t.reshape(rows, _LANES)

    block_rows = min(_MAX_BLOCK_ROWS, rows)   # == full rows (allowed) when small
    grid = (pl.cdiv(rows, block_rows),)
    need_mask = (lane_pad != 0) or (rows % block_rows != 0)

    kernel = functools.partial(
        _tversky_sums_kernel,
        total_n=n, block_rows=block_rows, need_mask=need_mask)

    sums = pl.pallas_call(
        kernel,
        out_shape=jax.ShapeDtypeStruct((3,), jnp.float32),
        grid_spec=pltpu.PrefetchScalarGridSpec(
            num_scalar_prefetch=0,
            grid=grid,
            in_specs=[
                pl.BlockSpec((block_rows, _LANES), lambda i: (i, 0)),
                pl.BlockSpec((block_rows, _LANES), lambda i: (i, 0)),
            ],
            out_specs=pl.BlockSpec(memory_space=pltpu.SMEM),
            scratch_shapes=[
                pltpu.VMEM((block_rows, _LANES), jnp.float32),
                pltpu.VMEM((block_rows, _LANES), jnp.float32),
                pltpu.VMEM((block_rows, _LANES), jnp.float32),
            ],
        ),
        compiler_params=pltpu.CompilerParams(
            # Single grid axis is a sequential reduction over an accumulator.
            dimension_semantics=("arbitrary",),
        ),
    )(x2, t2)
    return sums[0], sums[1], sums[2]


@functools.partial(jax.jit, static_argnames=("alpha", "beta", "gamma", "smooth"))
def asymmetric_focal_tversky_loss(inputs, targets, alpha=0.3, beta=0.7,
                                  gamma=0.75, smooth=1e-5):
    """JAX/Pallas equivalent of AsymmetricFocalTverskyLoss.forward.

    inputs:  (B, 1, H, W) raw logits
    targets: (B, 1, H, W) ground-truth labels in {0, 1}
    returns: scalar f32 loss
    """
    s_pt, s_p, s_t = _tversky_sums(inputs, targets)
    tp = s_pt
    fp = s_p - s_pt
    fn = s_t - s_pt
    tversky_index = (tp + smooth) / (tp + alpha * fn + beta * fp + smooth)
    return jnp.power(1.0 - tversky_index, gamma)


def _reference_loss(inputs, targets, alpha=0.3, beta=0.7, gamma=0.75, smooth=1e-5):
    """Pure-JAX reference mirroring the PyTorch module exactly."""
    p = jax.nn.sigmoid(inputs.astype(jnp.float32)).reshape(-1)
    t = targets.reshape(-1).astype(jnp.float32)
    tp = jnp.sum(p * t)
    fp = jnp.sum(p * (1.0 - t))
    fn = jnp.sum((1.0 - p) * t)
    ti = (tp + smooth) / (tp + alpha * fn + beta * fp + smooth)
    return jnp.power(1.0 - ti, gamma)


if __name__ == "__main__":
    key = jax.random.PRNGKey(0)
    k_in, k_tgt, k_in2, k_tgt2 = jax.random.split(key, 4)

    # Primary test: lane-aligned (B, 1, H, W) as required by the module.
    B, C, H, W = 2, 1, 16, 16
    inputs = jax.random.normal(k_in, (B, C, H, W), dtype=jnp.float32)
    targets = jax.random.bernoulli(k_tgt, p=0.3, shape=(B, C, H, W)).astype(jnp.float32)

    loss = jax.block_until_ready(asymmetric_focal_tversky_loss(inputs, targets))
    ref = jax.block_until_ready(_reference_loss(inputs, targets))
    assert jnp.allclose(loss, ref, rtol=1e-4, atol=1e-6), (loss, ref)

    # Secondary test: ragged shape exercising the in-kernel tail mask.
    B2, C2, H2, W2 = 2, 1, 15, 17
    inputs2 = jax.random.normal(k_in2, (B2, C2, H2, W2), dtype=jnp.float32)
    targets2 = jax.random.bernoulli(k_tgt2, p=0.3, shape=(B2, C2, H2, W2)).astype(jnp.float32)

    loss2 = jax.block_until_ready(asymmetric_focal_tversky_loss(inputs2, targets2))
    ref2 = jax.block_until_ready(_reference_loss(inputs2, targets2))
    assert jnp.allclose(loss2, ref2, rtol=1e-4, atol=1e-6), (loss2, ref2)

    print("KERNEL_OK")
</pallas_src>

<mosaic_0001>
module attributes {stable_mosaic.version = 11 : i64} {
  func.func @_tversky_sums_kernel(%arg0: i32, %arg1: memref<4x128xf32, #tpu.memory_space<vmem>>, %arg2: memref<4x128xf32, #tpu.memory_space<vmem>>, %arg3: memref<3xf32, #tpu.memory_space<smem>>, %arg4: memref<4x128xf32, #tpu.memory_space<vmem>>, %arg5: memref<4x128xf32, #tpu.memory_space<vmem>>, %arg6: memref<4x128xf32, #tpu.memory_space<vmem>>) attributes {dimension_semantics = [#tpu.dimension_semantics<arbitrary>], iteration_bounds = array<i64: 1>, scalar_prefetch = 0 : i64, scratch_operands = 3 : i64, tpu.core_type = #tpu.core_type<tc>, window_params = [{transform_indices = @transform_0, window_bounds = array<i64: 4, 128>}, {transform_indices = @transform_1, window_bounds = array<i64: 4, 128>}, {transform_indices = @transform_2, window_bounds = array<i64: 3>}]} {
    %c0_i32 = arith.constant 0 : i32
    %0 = arith.cmpi eq, %arg0, %c0_i32 : i32
    %1 = arith.extui %0 : i1 to i32
    %c0_i32_0 = arith.constant 0 : i32
    %2 = arith.cmpi ne, %1, %c0_i32_0 : i32
    scf.if %2 {
      %cst_18 = arith.constant 0.000000e+00 : f32
      %23 = vector.broadcast %cst_18 : f32 to vector<4x128xf32>
      %c0_19 = arith.constant 0 : index
      %c0_20 = arith.constant 0 : index
      %24 = vector.load %arg4[%c0_19, %c0_20] : memref<4x128xf32, #tpu.memory_space<vmem>>, vector<4x128xf32>
      tpu.vector_store %arg4[%c0_19, %c0_20], %23 {strides = array<i32>} : memref<4x128xf32, #tpu.memory_space<vmem>>, vector<4x128xf32>,
      %cst_21 = arith.constant 0.000000e+00 : f32
      %25 = vector.broadcast %cst_21 : f32 to vector<4x128xf32>
      %c0_22 = arith.constant 0 : index
      %c0_23 = arith.constant 0 : index
      %26 = vector.load %arg5[%c0_22, %c0_23] : memref<4x128xf32, #tpu.memory_space<vmem>>, vector<4x128xf32>
      tpu.vector_store %arg5[%c0_22, %c0_23], %25 {strides = array<i32>} : memref<4x128xf32, #tpu.memory_space<vmem>>, vector<4x128xf32>,
      %cst_24 = arith.constant 0.000000e+00 : f32
      %27 = vector.broadcast %cst_24 : f32 to vector<4x128xf32>
      %c0_25 = arith.constant 0 : index
      %c0_26 = arith.constant 0 : index
      %28 = vector.load %arg6[%c0_25, %c0_26] : memref<4x128xf32, #tpu.memory_space<vmem>>, vector<4x128xf32>
      tpu.vector_store %arg6[%c0_25, %c0_26], %27 {strides = array<i32>} : memref<4x128xf32, #tpu.memory_space<vmem>>, vector<4x128xf32>,
    } else {
    }
    %c0 = arith.constant 0 : index
    %c0_1 = arith.constant 0 : index
    %3 = vector.load %arg1[%c0, %c0_1] : memref<4x128xf32, #tpu.memory_space<vmem>>, vector<4x128xf32>
    %4 = arith.negf %3 : vector<4x128xf32>
    %5 = math.exp %4 : vector<4x128xf32>
    %cst = arith.constant 1.000000e+00 : f32
    %6 = vector.broadcast %cst : f32 to vector<4x128xf32>
    %7 = arith.addf %6, %5 : vector<4x128xf32>
    %8 = arith.divf %6, %7 : vector<4x128xf32>
    %c0_2 = arith.constant 0 : index
    %c0_3 = arith.constant 0 : index
    %9 = vector.load %arg2[%c0_2, %c0_3] : memref<4x128xf32, #tpu.memory_space<vmem>>, vector<4x128xf32>
    %c0_4 = arith.constant 0 : index
    %c0_5 = arith.constant 0 : index
    %10 = vector.load %arg4[%c0_4, %c0_5] : memref<4x128xf32, #tpu.memory_space<vmem>>, vector<4x128xf32>
    %11 = arith.mulf %8, %9 : vector<4x128xf32>
    %12 = arith.addf %10, %11 : vector<4x128xf32>
    %c0_6 = arith.constant 0 : index
    %c0_7 = arith.constant 0 : index
    %13 = vector.load %arg4[%c0_6, %c0_7] : memref<4x128xf32, #tpu.memory_space<vmem>>, vector<4x128xf32>
    tpu.vector_store %arg4[%c0_6, %c0_7], %12 {strides = array<i32>} : memref<4x128xf32, #tpu.memory_space<vmem>>, vector<4x128xf32>,
    %c0_8 = arith.constant 0 : index
    %c0_9 = arith.constant 0 : index
    %14 = vector.load %arg5[%c0_8, %c0_9] : memref<4x128xf32, #tpu.memory_space<vmem>>, vector<4x128xf32>
    %15 = arith.addf %14, %8 : vector<4x128xf32>
    %c0_10 = arith.constant 0 : index
    %c0_11 = arith.constant 0 : index
    %16 = vector.load %arg5[%c0_10, %c0_11] : memref<4x128xf32, #tpu.memory_space<vmem>>, vector<4x128xf32>
    tpu.vector_store %arg5[%c0_10, %c0_11], %15 {strides = array<i32>} : memref<4x128xf32, #tpu.memory_space<vmem>>, vector<4x128xf32>,
    %c0_12 = arith.constant 0 : index
    %c0_13 = arith.constant 0 : index
    %17 = vector.load %arg6[%c0_12, %c0_13] : memref<4x128xf32, #tpu.memory_space<vmem>>, vector<4x128xf32>
    %18 = arith.addf %17, %9 : vector<4x128xf32>
    %c0_14 = arith.constant 0 : index
    %c0_15 = arith.constant 0 : index
    %19 = vector.load %arg6[%c0_14, %c0_15] : memref<4x128xf32, #tpu.memory_space<vmem>>, vector<4x128xf32>
    tpu.vector_store %arg6[%c0_14, %c0_15], %18 {strides = array<i32>} : memref<4x128xf32, #tpu.memory_space<vmem>>, vector<4x128xf32>,
    %c0_i32_16 = arith.constant 0 : i32
    %20 = arith.cmpi eq, %arg0, %c0_i32_16 : i32
    %21 = arith.extui %20 : i1 to i32
    %c0_i32_17 = arith.constant 0 : i32
    %22 = arith.cmpi ne, %21, %c0_i32_17 : i32
    scf.if %22 {
      %c0_18 = arith.constant 0 : index
      %c0_19 = arith.constant 0 : index
      %23 = vector.load %arg4[%c0_18, %c0_19] : memref<4x128xf32, #tpu.memory_space<vmem>>, vector<4x128xf32>
      %24 = vector.shape_cast %23 : vector<4x128xf32> to vector<1x4x128xf32>
      %cst_20 = arith.constant dense<0.000000e+00> : vector<1xf32>
      %25 = vector.multi_reduction <add>, %24, %cst_20 [1, 2] : vector<1x4x128xf32> to vector<1xf32>
      %26 = vector.shape_cast %25 : vector<1xf32> to vector<1x1x1xf32>
      %27 = vector.extract %26[0, 0, 0] : f32 from vector<1x1x1xf32>
      %c0_21 = arith.constant 0 : index
      %28 = memref.load %arg3[%c0_21] : memref<3xf32, #tpu.memory_space<smem>>
      memref.store %27, %arg3[%c0_21] : memref<3xf32, #tpu.memory_space<smem>>
      %c0_22 = arith.constant 0 : index
      %c0_23 = arith.constant 0 : index
      %29 = vector.load %arg5[%c0_22, %c0_23] : memref<4x128xf32, #tpu.memory_space<vmem>>, vector<4x128xf32>
      %30 = vector.shape_cast %29 : vector<4x128xf32> to vector<1x4x128xf32>
      %cst_24 = arith.constant dense<0.000000e+00> : vector<1xf32>
      %31 = vector.multi_reduction <add>, %30, %cst_24 [1, 2] : vector<1x4x128xf32> to vector<1xf32>
      %32 = vector.shape_cast %31 : vector<1xf32> to vector<1x1x1xf32>
      %33 = vector.extract %32[0, 0, 0] : f32 from vector<1x1x1xf32>
      %c1 = arith.constant 1 : index
      %34 = memref.load %arg3[%c1] : memref<3xf32, #tpu.memory_space<smem>>
      memref.store %33, %arg3[%c1] : memref<3xf32, #tpu.memory_space<smem>>
      %c0_25 = arith.constant 0 : index
      %c0_26 = arith.constant 0 : index
      %35 = vector.load %arg6[%c0_25, %c0_26] : memref<4x128xf32, #tpu.memory_space<vmem>>, vector<4x128xf32>
      %36 = vector.shape_cast %35 : vector<4x128xf32> to vector<1x4x128xf32>
      %cst_27 = arith.constant dense<0.000000e+00> : vector<1xf32>
      %37 = vector.multi_reduction <add>, %36, %cst_27 [1, 2] : vector<1x4x128xf32> to vector<1xf32>
      %38 = vector.shape_cast %37 : vector<1xf32> to vector<1x1x1xf32>
      %39 = vector.extract %38[0, 0, 0] : f32 from vector<1x1x1xf32>
      %c2 = arith.constant 2 : index
      %40 = memref.load %arg3[%c2] : memref<3xf32, #tpu.memory_space<smem>>
      memref.store %39, %arg3[%c2] : memref<3xf32, #tpu.memory_space<smem>>
    } else {
    }
    return
  }
  func.func @transform_0(%arg0: i32) -> (i32, i32) {
    %c0_i32 = arith.constant 0 : i32
    %c0_i32_0 = arith.constant 0 : i32
    return %arg0, %c0_i32 : i32, i32
  }
  func.func @transform_1(%arg0: i32) -> (i32, i32) {
    %c0_i32 = arith.constant 0 : i32
    %c0_i32_0 = arith.constant 0 : i32
    return %arg0, %c0_i32 : i32, i32
  }
  func.func @transform_2(%arg0: i32) -> i32 {
    %c0_i32 = arith.constant 0 : i32
    %c0_i32_0 = arith.constant 0 : i32
    return %c0_i32 : i32
  }
}

</mosaic_0001>

<bundles_post_ra>
// kernel: asymmetric_focal_tversky_loss.1
= control target key start
LH: loop header
LB: loop body
LE: loop exit
PB: predicated region body
PF: predicated region fallthrough
CT: control target
= control target key end

     0   :  { %v122_v1 = vmov 0.0   ;;  %s151_s0 = inlined_call_operand.vmem [shape: f32[4,128], index: 0, kind: input, shape index: {}]   ;;  %s152_s1 = inlined_call_operand.vmem [shape: f32[4,128], index: 1, kind: input, shape index: {}]   ;;  %s153_s2 = inlined_call_operand.vmem [shape: f32[3], index: 2, kind: output, shape index: {}]  }
   0x1   :  { %v19_v0 = vld [vmem:[%s151_s0] sm:$0xf]  ;;  %18 = vst [vmem:[#allocation4] sm:$0xf] %v122_v1  ;;  %16 = vst [vmem:[#allocation2] sm:$0xf] %v122_v1 }
   0x2   :  { %17 = vst [vmem:[#allocation3] sm:$0xf] %v122_v1  ;;  %v95_v2 = vmul.f32 -1.442695, %v19_v0 }
   0x3   :  { %7 = vsyncpa [#allocation6], 0  ;;  %v26_v3 = vld [vmem:[%s152_s1] sm:$0xf]  ;;  %vm41_vm0 = vcmask 1043456   ;;  %s86_s14 = sshll.u32 %s153_s2, 4  ;;  %s87_s14 = int_to_ptr.vmem [resolvable:$true] %s86_s14 }
   0x4   :  { %104 = vpow2.f32 %v95_v2  ;;  %s108_s17 = scalar_lea.vmem %s87_s14, 16  ;;  %p113_p1 = scmp.lt.s32.totalorder %s87_s14, %s87_s14 }
   0x5   :  { %p109_p0 = scmp.ne.s32.totalorder %s87_s14, %s108_s17  ;;  %p114_p2 = scmp.lt.s32.totalorder %s108_s17, %s108_s17 }
   0x7   :  { %p115_p3 = por %p114_p2, %p113_p1 }
   0x8   :  { %v34_v4 = vld [vmem:[#allocation4] sm:$0xf]  ;;  %v27_v12 = vld [vmem:[#allocation2] sm:$0xf] }
   0x9   :  { %v35_v5 = vadd.f32 %v34_v4, %v26_v3  ;;  %v31_v10 = vld [vmem:[#allocation3] sm:$0xf]  ;;  %p116_p4 = pnand %p115_p3, %p109_p0 }
   0xb   :  { %36 = vst [vmem:[#allocation4] sm:$0xf] %v35_v5 }
   0xe   :  { %v105_v6 = vpop.eup %104 }
   0xf   :  { %v23_v7 = vadd.f32 1.0, %v105_v6 }
  0x11   :  { %106 = vrcp.f32 %v23_v7 }
  0x12   :  { %v67_v8 = vld [vmem:[#allocation4] sm:$0xf] }
  0x13   :  { %v68_v9 = vsel %vm41_vm0, %v67_v8, 0.0 }
  0x14   :  { %69 = vadd.xlane.f32.xlu1 %v68_v9 }
  0x1b   :  { %v107_v11 = vpop.eup %106 }
  0x1c   :  { %v28_v13 = vmul.f32 %v107_v11, %v26_v3  ;;  %v32_v14 = vadd.f32 %v107_v11, %v31_v10 }
  0x1e   :  { %v29_v15 = vadd.f32 %v28_v13, %v27_v12  ;;  %33 = vst [vmem:[#allocation3] sm:$0xf] %v32_v14 }
  0x20   :  { %30 = vst [vmem:[#allocation2] sm:$0xf] %v29_v15 }
  0x25   :  { %v54_v17 = vld [vmem:[#allocation3] sm:$0xf] }
  0x26   :  { %v55_v19 = vsel %vm41_vm0, %v54_v17, 0.0 }
  0x27   :  { %v40_v16 = vld [vmem:[#allocation2] sm:$0xf] }
  0x28   :  { %v42_v18 = vsel %vm41_vm0, %v40_v16, 0.0 }
  0x29   :  { %43 = vadd.xlane.f32.xlu0 %v42_v18 }
  0x2d   :  { %56 = vadd.xlane.f32.xlu0 %v55_v19 }
  0xa1   :  { %v70_v20 = vpop.xlane.xlu1 %69 }
  0xa2   :  { %v71_v21 = vrot.slane %v70_v20, 4 }
  0xa4   :  { %v72_v22 = vadd.f32 %v71_v21, %v70_v20 }
  0xa6   :  { %v73_v26 = vrot.slane %v72_v22, 2 }
  0xa8   :  { %v74_v32 = vadd.f32 %v73_v26, %v72_v22 }
  0xaa   :  { %v75_v37 = vrot.slane %v74_v32, 1 }
  0xac   :  { %v76_v40 = vadd.f32 %v75_v37, %v74_v32 }
  0xb6   :  { %v44_v23 = vpop.xlane.xlu0 %43 }
  0xb7   :  { %v45_v24 = vrot.slane %v44_v23, 4 }
  0xb9   :  { %v46_v25 = vadd.f32 %v45_v24, %v44_v23 }
  0xba   :  { %v57_v27 = vpop.xlane.xlu0 %56 }
  0xbb   :  { %v47_v28 = vrot.slane %v46_v25, 2  ;;  %v58_v29 = vrot.slane %v57_v27, 4 }
  0xbd   :  { %v59_v30 = vadd.f32 %v58_v29, %v57_v27  ;;  %v48_v31 = vadd.f32 %v47_v28, %v46_v25 }
  0xbf   :  { %v60_v33 = vrot.slane %v59_v30, 2  ;;  %v49_v34 = vrot.slane %v48_v31, 1 }
  0xc1   :  { %v61_v35 = vadd.f32 %v60_v33, %v59_v30  ;;  %v50_v36 = vadd.f32 %v49_v34, %v48_v31 }
  0xc3   :  { %96 = vpush %v50_v36  ;;  %v62_v38 = vrot.slane %v61_v35, 1 }
  0xc5   :  { %v63_v39 = vadd.f32 %v62_v38, %v61_v35 }
  0xc7   :  { %98 = vpush %v63_v39 }
  0xc8   :  { %100 = vpush %v76_v40 }
  0xf4   :  { %s97_s0 = spop %96 }
  0xf5   :  { %53 = sst [smem:[#allocation5]] %s97_s0 }
  0xf8   :  { %s99_s15 = spop %98 }
  0xf9   :  { %66 = sst [smem:[#allocation5 + $0x1]] %s99_s15  ;;  %s101_s16 = spop %100 }
  0xfa   :  { %79 = sst [smem:[#allocation5 + $0x2]] %s101_s16 }
  0xfb   :  { %119 = shalt.err (!%p116_p4)
}
  0xfc   :  { %s123_s18 = smov [#allocation5]  }
  0xfd   :  { %89 = dma.smem_to_vmem %s123_s18, 16, %s87_s14, [#allocation6]  }
  0xfe   :  { %120 = dma.done.wait [#allocation6], 16  }
  0xff   :  { %121 = vsyncadd [#allocation6], 4294967280 }
 0x100   :  { %93 = sfence }
 0x101   :  { %94 = vsyncpa [#allocation6], 1 }

</bundles_post_ra>
